<compile_context>
chip_gen: v7x
topology: tpu7x:2x2x1
jax: 0.10.0
libtpu: 0.0.40
codegen_flags: <defaults>
</compile_context>

<pallas_src>
import functools

import jax
import jax.numpy as jnp
from jax.experimental import pallas as pl
from jax.experimental.pallas import tpu as pltpu


# ---------------------------------------------------------------------------
# In-kernel helpers (operate on traced values; w1/w2 are static Python floats)
# ---------------------------------------------------------------------------
def _scale(x, s):
  return x if s == 1.0 else s * x


def _skip_blend(h, c, h_sk, c_sk, w1, w2):
  """Skip-connection blend with statically constant-folded weights."""
  inv = 1.0 / (w1 + w2)
  if w2 == 0.0:                       # (1, 0): identity — blend disappears.
    return _scale(h, w1 * inv), _scale(c, w1 * inv)
  th = jnp.tanh(h_sk)
  tc = jnp.tanh(c_sk)
  if w1 == 0.0:                       # (0, 1): pure skip path.
    return _scale(th, w2 * inv), _scale(tc, w2 * inv)
  return ((_scale(h, w1) + _scale(th, w2)) * inv,
          (_scale(c, w1) + _scale(tc, w2)) * inv)


def _lstm_cell(gates, c, H):
  """PyTorch LSTMCell gate math (gate order i, f, g, o).

  sigmoid/tanh are applied to the whole [B, 4H] gates tensor (2 EUP pushes per
  step instead of 4 quarter-vreg ones) and sliced afterwards.
  """
  sig = jax.nn.sigmoid(gates)
  tnh = jnp.tanh(gates)
  i_g = sig[:, 0 * H:1 * H]
  f_g = sig[:, 1 * H:2 * H]
  g_g = tnh[:, 2 * H:3 * H]
  o_g = sig[:, 3 * H:4 * H]
  c = f_g * c + i_g * g_g
  h = o_g * jnp.tanh(c)
  return h, c


# ---------------------------------------------------------------------------
# Kernels
# ---------------------------------------------------------------------------
def _rscn_encoder_kernel(x_ref, h0_ref, c0_ref, wih_ref, whh_ref, b_ref,
                         out_ref, hN_ref, cN_ref,
                         *, time_steps, skip_size, skip_w1, skip_w2):
  B, H = h0_ref.shape

  # Hoisted input projection: one [T*B, D_in] x [D_in, 4H] matmul, bias folded
  # in.  Only h @ W_hh remains on the per-step serial chain.
  pre = (jnp.dot(x_ref[...], wih_ref[...], preferred_element_type=jnp.float32)
         + b_ref[...])                                   # [T*B, 4H]
  whh = whh_ref[...]

  h = h0_ref[...]
  c = c0_ref[...]
  skip = [(h, c) for _ in range(skip_size)]
  outs = []

  # TODO(synk): for long sequences replace the static unroll with
  # lax.fori_loop + a VMEM ring buffer for the skip states.
  for t in range(time_steps):
    gates = pre[t * B:(t + 1) * B, :] + jnp.dot(
        h, whh, preferred_element_type=jnp.float32)      # [B, 4H]
    h, c = _lstm_cell(gates, c, H)

    h_sk, c_sk = skip[t % skip_size]
    skip[t % skip_size] = (h, c)                          # push raw LSTM state
    h, c = _skip_blend(h, c, h_sk, c_sk, skip_w1[t], skip_w2[t])

    outs.append(h)

  # Single lane-dense store: [B, T*H] instead of T masked [B, H] stores.
  out_ref[...] = jnp.concatenate(outs, axis=1)
  hN_ref[...] = h
  cN_ref[...] = c


def _rscn_decoder_kernel(g0x_ref, h0_ref, c0_ref, whh_ref, wcomb_ref,
                         bcomb_ref, wlin_ref, blin_ref,
                         out_ref, hN_ref, cN_ref,
                         *, time_steps, skip_size, skip_w1, skip_w2):
  B, H = h0_ref.shape

  whh = whh_ref[...]
  wcomb = wcomb_ref[...]
  # Hoist the bias broadcast out of the unrolled loop (JAX does not CSE it).
  bias = jnp.broadcast_to(bcomb_ref[...], (B, wcomb.shape[1]))

  h = h0_ref[...]
  c = c0_ref[...]
  skip = [(h, c) for _ in range(skip_size)]
  outs = []

  for t in range(time_steps):
    if t == 0:
      # Step 0: input is x[:, 0, :]; its projection (+ bias) was precomputed.
      gates = g0x_ref[...] + jnp.dot(h, whh,
                                     preferred_element_type=jnp.float32)
    else:
      # Steps >= 1: feedback y = h @ W_lin + b_lin folded into the recurrence:
      # gates = h @ (W_hh + W_lin @ W_ih) + (b + b_lin @ W_ih).
      gates = bias + jnp.dot(h, wcomb, preferred_element_type=jnp.float32)
    h, c = _lstm_cell(gates, c, H)

    h_sk, c_sk = skip[t % skip_size]
    skip[t % skip_size] = (h, c)
    h, c = _skip_blend(h, c, h_sk, c_sk, skip_w1[t], skip_w2[t])

    outs.append(h)

  # One batched output projection after the loop instead of T tiny matmuls on
  # the serial chain: [T*B, H] x [H, D_in].
  h_all = jnp.concatenate(outs, axis=0)                   # [T*B, H]
  out_ref[...] = (jnp.dot(h_all, wlin_ref[...],
                          preferred_element_type=jnp.float32)
                  + blin_ref[...])
  hN_ref[...] = h
  cN_ref[...] = c


# ---------------------------------------------------------------------------
# Wrapper
# ---------------------------------------------------------------------------
def rscn_forward(x, init_hidden, params, *, time_steps, skip_size, is_decoder,
                 skip_w1, skip_w2):
  """Builds the pallas_call for one RSCN forward pass."""
  B, T, D_in = x.shape
  h0, c0 = init_hidden
  H = h0.shape[1]
  wih_t, whh_t, b, wlin_t, blin = params

  # Static (host) skip weights, baked into the kernel at trace time.
  skip_w1 = tuple(float(w) for w in skip_w1)
  skip_w2 = tuple(float(w) for w in skip_w2)

  vmem = pl.BlockSpec(memory_space=pltpu.MemorySpace.VMEM)
  state_shapes = (jax.ShapeDtypeStruct((B, H), jnp.float32),
                  jax.ShapeDtypeStruct((B, H), jnp.float32))

  # TODO(synk): at production B/T/H, add a batch grid with BlockSpec tiling,
  # dimension_semantics=("parallel",) (shards across v7x's 2 TensorCores) and
  # vmem_limit_bytes; at these toy sizes a grid only adds serial overhead.

  if not is_decoder:
    # Time-major [T*B, D_in] so each step's rows are contiguous sublanes.
    x_tm = jnp.transpose(x[:, :time_steps, :], (1, 0, 2)).reshape(
        time_steps * B, D_in)
    kernel = functools.partial(
        _rscn_encoder_kernel, time_steps=time_steps, skip_size=skip_size,
        skip_w1=skip_w1, skip_w2=skip_w2)
    out_flat, hN, cN = pl.pallas_call(
        kernel,
        out_shape=(jax.ShapeDtypeStruct((B, time_steps * H), jnp.float32),)
                  + state_shapes,
        in_specs=[vmem] * 6,
        out_specs=(vmem, vmem, vmem),
    )(x_tm, h0, c0, wih_t, whh_t, b)
    out = out_flat.reshape(B, time_steps, H)
  else:
    # Fold the decoder feedback projection into the recurrence (wrapper-side
    # parameter prep, mathematically equivalent up to fp rounding).
    wcomb = whh_t + wlin_t @ wih_t          # [H, 4H]
    bcomb = b + blin @ wih_t                # [1, 4H]
    g0x = x[:, 0, :] @ wih_t + b            # step-0 input projection (+ bias)
    kernel = functools.partial(
        _rscn_decoder_kernel, time_steps=time_steps, skip_size=skip_size,
        skip_w1=skip_w1, skip_w2=skip_w2)
    y_flat, hN, cN = pl.pallas_call(
        kernel,
        out_shape=(jax.ShapeDtypeStruct((time_steps * B, D_in), jnp.float32),)
                  + state_shapes,
        in_specs=[vmem] * 8,
        out_specs=(vmem, vmem, vmem),
    )(g0x, h0, c0, whh_t, wcomb, bcomb, wlin_t, blin)
    out = y_flat.reshape(time_steps, B, D_in).transpose(1, 0, 2)
  return out, (hN, cN)


# ---------------------------------------------------------------------------
# Pure-JAX reference (mirrors the PyTorch semantics) for a correctness check.
# ---------------------------------------------------------------------------
def rscn_reference(x, init_hidden, params, *, time_steps, skip_size,
                   is_decoder, skip_w1, skip_w2):
  B, T, D_in = x.shape
  h, c = init_hidden
  H = h.shape[1]
  wih_t, whh_t, b, wlin_t, blin = params
  skip = [(h, c) for _ in range(skip_size)]
  cur_in = x[:, 0, :]
  outs = []
  for t in range(time_steps):
    if not is_decoder:
      cur_in = x[:, t, :]
    gates = cur_in @ wih_t + h @ whh_t + b
    i_g = jax.nn.sigmoid(gates[:, 0 * H:1 * H])
    f_g = jax.nn.sigmoid(gates[:, 1 * H:2 * H])
    g_g = jnp.tanh(gates[:, 2 * H:3 * H])
    o_g = jax.nn.sigmoid(gates[:, 3 * H:4 * H])
    c = f_g * c + i_g * g_g
    h = o_g * jnp.tanh(c)
    h_sk, c_sk = skip[t % skip_size]
    skip[t % skip_size] = (h, c)
    w1, w2 = skip_w1[t], skip_w2[t]
    norm = 1.0 / (w1 + w2)
    h = (w1 * h + w2 * jnp.tanh(h_sk)) * norm
    c = (w1 * c + w2 * jnp.tanh(c_sk)) * norm
    if is_decoder:
      y = h @ wlin_t + blin
      outs.append(y)
      cur_in = y
    else:
      outs.append(h)
  return jnp.stack(outs, axis=1), (h, c)


def make_skip_weights(key, time_steps, skip_size):
  """Deterministic replica of RSCN.random_weights (w1,w2 in {0,1}, w1+w2>=1)."""
  w1s, w2s = [], []
  for t in range(time_steps):
    if t < skip_size:
      w1, w2 = 1.0, 0.0
    else:
      key, k1, k2 = jax.random.split(key, 3)
      w1 = int(jax.random.randint(k1, (), 0, 2))
      w2 = 1 if w1 == 0 else int(jax.random.randint(k2, (), 0, 2))
      w1, w2 = float(w1), float(w2)
    w1s.append(w1)
    w2s.append(w2)
  return tuple(w1s), tuple(w2s)


def init_params(key, input_dim, hidden_dim):
  """Deterministic parameter init (PyTorch-style U(-1/sqrt(H), 1/sqrt(H)))."""
  k = 1.0 / jnp.sqrt(jnp.float32(hidden_dim))
  keys = jax.random.split(key, 6)
  wih_t = jax.random.uniform(keys[0], (input_dim, 4 * hidden_dim), jnp.float32, -k, k)
  whh_t = jax.random.uniform(keys[1], (hidden_dim, 4 * hidden_dim), jnp.float32, -k, k)
  b_ih = jax.random.uniform(keys[2], (1, 4 * hidden_dim), jnp.float32, -k, k)
  b_hh = jax.random.uniform(keys[3], (1, 4 * hidden_dim), jnp.float32, -k, k)
  b = b_ih + b_hh                      # LSTMCell adds both biases
  wlin_t = jax.random.uniform(keys[4], (hidden_dim, input_dim), jnp.float32, -k, k)
  blin = jax.random.uniform(keys[5], (1, input_dim), jnp.float32, -k, k)
  return wih_t, whh_t, b, wlin_t, blin


if __name__ == "__main__":
  B, T, D_IN, H, SKIP = 2, 8, 8, 32, 3

  key = jax.random.PRNGKey(0)
  k_x, k_p, k_h, k_c, k_w = jax.random.split(key, 5)

  x = jax.random.normal(k_x, (B, T, D_IN), jnp.float32)
  params = init_params(k_p, D_IN, H)
  # Encoder mode in PyTorch draws torch.rand for the initial hidden; we draw
  # the equivalent uniform [0,1) init deterministically here.
  h0 = jax.random.uniform(k_h, (B, H), jnp.float32)
  c0 = jax.random.uniform(k_c, (B, H), jnp.float32)
  skip_w1, skip_w2 = make_skip_weights(k_w, T, SKIP)

  for is_decoder in (False, True):
    out, (hN, cN) = rscn_forward(
        x, (h0, c0), params,
        time_steps=T, skip_size=SKIP, is_decoder=is_decoder,
        skip_w1=skip_w1, skip_w2=skip_w2)
    jax.block_until_ready((out, hN, cN))

    ref_out, (ref_h, ref_c) = rscn_reference(
        x, (h0, c0), params,
        time_steps=T, skip_size=SKIP, is_decoder=is_decoder,
        skip_w1=skip_w1, skip_w2=skip_w2)

    assert out.shape == (B, T, D_IN if is_decoder else H)
    # Decoder folding (W_hh + W_lin @ W_ih) is mathematically equivalent but
    # reorders fp ops slightly vs. the reference -> tolerance 1e-4.
    assert jnp.allclose(out, ref_out, atol=1e-4, rtol=1e-4), "output mismatch"
    assert jnp.allclose(hN, ref_h, atol=1e-4, rtol=1e-4), "h mismatch"
    assert jnp.allclose(cN, ref_c, atol=1e-4, rtol=1e-4), "c mismatch"

  print("KERNEL_OK")
</pallas_src>

<mosaic_0001>
module attributes {stable_mosaic.version = 11 : i64} {
  func.func @_rscn_encoder_kernel(%arg0: memref<16x8xf32, #tpu.memory_space<vmem>>, %arg1: memref<2x32xf32, #tpu.memory_space<vmem>>, %arg2: memref<2x32xf32, #tpu.memory_space<vmem>>, %arg3: memref<8x128xf32, #tpu.memory_space<vmem>>, %arg4: memref<32x128xf32, #tpu.memory_space<vmem>>, %arg5: memref<1x128xf32, #tpu.memory_space<vmem>>, %arg6: memref<2x256xf32, #tpu.memory_space<vmem>>, %arg7: memref<2x32xf32, #tpu.memory_space<vmem>>, %arg8: memref<2x32xf32, #tpu.memory_space<vmem>>) attributes {dimension_semantics = [], scalar_prefetch = 0 : i64, scratch_operands = 0 : i64, tpu.core_type = #tpu.core_type<tc>} {
    %c0 = arith.constant 0 : index
    %c0_0 = arith.constant 0 : index
    %0 = vector.load %arg0[%c0, %c0_0] : memref<16x8xf32, #tpu.memory_space<vmem>>, vector<16x8xf32>
    %c0_1 = arith.constant 0 : index
    %c0_2 = arith.constant 0 : index
    %1 = vector.load %arg3[%c0_1, %c0_2] : memref<8x128xf32, #tpu.memory_space<vmem>>, vector<8x128xf32>
    %cst = arith.constant dense<0.000000e+00> : vector<16x128xf32>
    %2 = tpu.matmul %0, %1, %cst {dimension_numbers = #tpu.dot_dimension_numbers<[1], [0], [0], [1], [0, 0, 1, 1], [], []>} : vector<16x8xf32>, vector<8x128xf32>, vector<16x128xf32> -> vector<16x128xf32>
    %c0_3 = arith.constant 0 : index
    %c0_4 = arith.constant 0 : index
    %3 = vector.load %arg5[%c0_3, %c0_4] : memref<1x128xf32, #tpu.memory_space<vmem>>, vector<1x128xf32>
    %4 = vector.broadcast %3 : vector<1x128xf32> to vector<16x128xf32>
    %5 = arith.addf %2, %4 : vector<16x128xf32>
    %c0_5 = arith.constant 0 : index
    %c0_6 = arith.constant 0 : index
    %6 = vector.load %arg4[%c0_5, %c0_6] : memref<32x128xf32, #tpu.memory_space<vmem>>, vector<32x128xf32>
    %c0_7 = arith.constant 0 : index
    %c0_8 = arith.constant 0 : index
    %7 = vector.load %arg1[%c0_7, %c0_8] : memref<2x32xf32, #tpu.memory_space<vmem>>, vector<2x32xf32>
    %c0_9 = arith.constant 0 : index
    %c0_10 = arith.constant 0 : index
    %8 = vector.load %arg2[%c0_9, %c0_10] : memref<2x32xf32, #tpu.memory_space<vmem>>, vector<2x32xf32>
    %9 = vector.extract_strided_slice %5 {offsets = [0, 0], sizes = [2, 128], strides = [1, 1]} : vector<16x128xf32> to vector<2x128xf32>
    %cst_11 = arith.constant dense<0.000000e+00> : vector<2x128xf32>
    %10 = tpu.matmul %7, %6, %cst_11 {dimension_numbers = #tpu.dot_dimension_numbers<[1], [0], [0], [1], [0, 0, 1, 1], [], []>} : vector<2x32xf32>, vector<32x128xf32>, vector<2x128xf32> -> vector<2x128xf32>
    %11 = arith.addf %9, %10 : vector<2x128xf32>
    %12 = arith.negf %11 : vector<2x128xf32>
    %13 = math.exp %12 : vector<2x128xf32>
    %cst_12 = arith.constant 1.000000e+00 : f32
    %14 = vector.broadcast %cst_12 : f32 to vector<2x128xf32>
    %15 = arith.addf %14, %13 : vector<2x128xf32>
    %16 = arith.divf %14, %15 : vector<2x128xf32>
    %17 = math.tanh %11 : vector<2x128xf32>
    %18 = vector.extract_strided_slice %16 {offsets = [0, 0], sizes = [2, 32], strides = [1, 1]} : vector<2x128xf32> to vector<2x32xf32>
    %19 = vector.extract_strided_slice %16 {offsets = [0, 32], sizes = [2, 32], strides = [1, 1]} : vector<2x128xf32> to vector<2x32xf32>
    %20 = vector.extract_strided_slice %17 {offsets = [0, 64], sizes = [2, 32], strides = [1, 1]} : vector<2x128xf32> to vector<2x32xf32>
    %21 = vector.extract_strided_slice %16 {offsets = [0, 96], sizes = [2, 32], strides = [1, 1]} : vector<2x128xf32> to vector<2x32xf32>
    %22 = arith.mulf %19, %8 : vector<2x32xf32>
    %23 = arith.mulf %18, %20 : vector<2x32xf32>
    %24 = arith.addf %22, %23 : vector<2x32xf32>
    %25 = math.tanh %24 : vector<2x32xf32>
    %26 = arith.mulf %21, %25 : vector<2x32xf32>
    %27 = vector.extract_strided_slice %5 {offsets = [2, 0], sizes = [2, 128], strides = [1, 1]} : vector<16x128xf32> to vector<2x128xf32>
    %cst_13 = arith.constant dense<0.000000e+00> : vector<2x128xf32>
    %28 = tpu.matmul %26, %6, %cst_13 {dimension_numbers = #tpu.dot_dimension_numbers<[1], [0], [0], [1], [0, 0, 1, 1], [], []>} : vector<2x32xf32>, vector<32x128xf32>, vector<2x128xf32> -> vector<2x128xf32>
    %29 = arith.addf %27, %28 : vector<2x128xf32>
    %30 = arith.negf %29 : vector<2x128xf32>
    %31 = math.exp %30 : vector<2x128xf32>
    %cst_14 = arith.constant 1.000000e+00 : f32
    %32 = vector.broadcast %cst_14 : f32 to vector<2x128xf32>
    %33 = arith.addf %32, %31 : vector<2x128xf32>
    %34 = arith.divf %32, %33 : vector<2x128xf32>
    %35 = math.tanh %29 : vector<2x128xf32>
    %36 = vector.extract_strided_slice %34 {offsets = [0, 0], sizes = [2, 32], strides = [1, 1]} : vector<2x128xf32> to vector<2x32xf32>
    %37 = vector.extract_strided_slice %34 {offsets = [0, 32], sizes = [2, 32], strides = [1, 1]} : vector<2x128xf32> to vector<2x32xf32>
    %38 = vector.extract_strided_slice %35 {offsets = [0, 64], sizes = [2, 32], strides = [1, 1]} : vector<2x128xf32> to vector<2x32xf32>
    %39 = vector.extract_strided_slice %34 {offsets = [0, 96], sizes = [2, 32], strides = [1, 1]} : vector<2x128xf32> to vector<2x32xf32>
    %40 = arith.mulf %37, %24 : vector<2x32xf32>
    %41 = arith.mulf %36, %38 : vector<2x32xf32>
    %42 = arith.addf %40, %41 : vector<2x32xf32>
    %43 = math.tanh %42 : vector<2x32xf32>
    %44 = arith.mulf %39, %43 : vector<2x32xf32>
    %45 = vector.extract_strided_slice %5 {offsets = [4, 0], sizes = [2, 128], strides = [1, 1]} : vector<16x128xf32> to vector<2x128xf32>
    %cst_15 = arith.constant dense<0.000000e+00> : vector<2x128xf32>
    %46 = tpu.matmul %44, %6, %cst_15 {dimension_numbers = #tpu.dot_dimension_numbers<[1], [0], [0], [1], [0, 0, 1, 1], [], []>} : vector<2x32xf32>, vector<32x128xf32>, vector<2x128xf32> -> vector<2x128xf32>
    %47 = arith.addf %45, %46 : vector<2x128xf32>
    %48 = arith.negf %47 : vector<2x128xf32>
    %49 = math.exp %48 : vector<2x128xf32>
    %cst_16 = arith.constant 1.000000e+00 : f32
    %50 = vector.broadcast %cst_16 : f32 to vector<2x128xf32>
    %51 = arith.addf %50, %49 : vector<2x128xf32>
    %52 = arith.divf %50, %51 : vector<2x128xf32>
    %53 = math.tanh %47 : vector<2x128xf32>
    %54 = vector.extract_strided_slice %52 {offsets = [0, 0], sizes = [2, 32], strides = [1, 1]} : vector<2x128xf32> to vector<2x32xf32>
    %55 = vector.extract_strided_slice %52 {offsets = [0, 32], sizes = [2, 32], strides = [1, 1]} : vector<2x128xf32> to vector<2x32xf32>
    %56 = vector.extract_strided_slice %53 {offsets = [0, 64], sizes = [2, 32], strides = [1, 1]} : vector<2x128xf32> to vector<2x32xf32>
    %57 = vector.extract_strided_slice %52 {offsets = [0, 96], sizes = [2, 32], strides = [1, 1]} : vector<2x128xf32> to vector<2x32xf32>
    %58 = arith.mulf %55, %42 : vector<2x32xf32>
    %59 = arith.mulf %54, %56 : vector<2x32xf32>
    %60 = arith.addf %58, %59 : vector<2x32xf32>
    %61 = math.tanh %60 : vector<2x32xf32>
    %62 = arith.mulf %57, %61 : vector<2x32xf32>
    %63 = vector.extract_strided_slice %5 {offsets = [6, 0], sizes = [2, 128], strides = [1, 1]} : vector<16x128xf32> to vector<2x128xf32>
    %cst_17 = arith.constant dense<0.000000e+00> : vector<2x128xf32>
    %64 = tpu.matmul %62, %6, %cst_17 {dimension_numbers = #tpu.dot_dimension_numbers<[1], [0], [0], [1], [0, 0, 1, 1], [], []>} : vector<2x32xf32>, vector<32x128xf32>, vector<2x128xf32> -> vector<2x128xf32>
    %65 = arith.addf %63, %64 : vector<2x128xf32>
    %66 = arith.negf %65 : vector<2x128xf32>
    %67 = math.exp %66 : vector<2x128xf32>
    %cst_18 = arith.constant 1.000000e+00 : f32
    %68 = vector.broadcast %cst_18 : f32 to vector<2x128xf32>
    %69 = arith.addf %68, %67 : vector<2x128xf32>
    %70 = arith.divf %68, %69 : vector<2x128xf32>
    %71 = math.tanh %65 : vector<2x128xf32>
    %72 = vector.extract_strided_slice %70 {offsets = [0, 0], sizes = [2, 32], strides = [1, 1]} : vector<2x128xf32> to vector<2x32xf32>
    %73 = vector.extract_strided_slice %70 {offsets = [0, 32], sizes = [2, 32], strides = [1, 1]} : vector<2x128xf32> to vector<2x32xf32>
    %74 = vector.extract_strided_slice %71 {offsets = [0, 64], sizes = [2, 32], strides = [1, 1]} : vector<2x128xf32> to vector<2x32xf32>
    %75 = vector.extract_strided_slice %70 {offsets = [0, 96], sizes = [2, 32], strides = [1, 1]} : vector<2x128xf32> to vector<2x32xf32>
    %76 = arith.mulf %73, %60 : vector<2x32xf32>
    %77 = arith.mulf %72, %74 : vector<2x32xf32>
    %78 = arith.addf %76, %77 : vector<2x32xf32>
    %79 = math.tanh %78 : vector<2x32xf32>
    %80 = arith.mulf %75, %79 : vector<2x32xf32>
    %81 = vector.extract_strided_slice %5 {offsets = [8, 0], sizes = [2, 128], strides = [1, 1]} : vector<16x128xf32> to vector<2x128xf32>
    %cst_19 = arith.constant dense<0.000000e+00> : vector<2x128xf32>
    %82 = tpu.matmul %80, %6, %cst_19 {dimension_numbers = #tpu.dot_dimension_numbers<[1], [0], [0], [1], [0, 0, 1, 1], [], []>} : vector<2x32xf32>, vector<32x128xf32>, vector<2x128xf32> -> vector<2x128xf32>
    %83 = arith.addf %81, %82 : vector<2x128xf32>
    %84 = arith.negf %83 : vector<2x128xf32>
    %85 = math.exp %84 : vector<2x128xf32>
    %cst_20 = arith.constant 1.000000e+00 : f32
    %86 = vector.broadcast %cst_20 : f32 to vector<2x128xf32>
    %87 = arith.addf %86, %85 : vector<2x128xf32>
    %88 = arith.divf %86, %87 : vector<2x128xf32>
    %89 = math.tanh %83 : vector<2x128xf32>
    %90 = vector.extract_strided_slice %88 {offsets = [0, 0], sizes = [2, 32], strides = [1, 1]} : vector<2x128xf32> to vector<2x32xf32>
    %91 = vector.extract_strided_slice %88 {offsets = [0, 32], sizes = [2, 32], strides = [1, 1]} : vector<2x128xf32> to vector<2x32xf32>
    %92 = vector.extract_strided_slice %89 {offsets = [0, 64], sizes = [2, 32], strides = [1, 1]} : vector<2x128xf32> to vector<2x32xf32>
    %93 = vector.extract_strided_slice %88 {offsets = [0, 96], sizes = [2, 32], strides = [1, 1]} : vector<2x128xf32> to vector<2x32xf32>
    %94 = arith.mulf %91, %78 : vector<2x32xf32>
    %95 = arith.mulf %90, %92 : vector<2x32xf32>
    %96 = arith.addf %94, %95 : vector<2x32xf32>
    %97 = math.tanh %96 : vector<2x32xf32>
    %98 = arith.mulf %93, %97 : vector<2x32xf32>
    %99 = vector.extract_strided_slice %5 {offsets = [10, 0], sizes = [2, 128], strides = [1, 1]} : vector<16x128xf32> to vector<2x128xf32>
    %cst_21 = arith.constant dense<0.000000e+00> : vector<2x128xf32>
    %100 = tpu.matmul %98, %6, %cst_21 {dimension_numbers = #tpu.dot_dimension_numbers<[1], [0], [0], [1], [0, 0, 1, 1], [], []>} : vector<2x32xf32>, vector<32x128xf32>, vector<2x128xf32> -> vector<2x128xf32>
    %101 = arith.addf %99, %100 : vector<2x128xf32>
    %102 = arith.negf %101 : vector<2x128xf32>
    %103 = math.exp %102 : vector<2x128xf32>
    %cst_22 = arith.constant 1.000000e+00 : f32
    %104 = vector.broadcast %cst_22 : f32 to vector<2x128xf32>
    %105 = arith.addf %104, %103 : vector<2x128xf32>
    %106 = arith.divf %104, %105 : vector<2x128xf32>
    %107 = math.tanh %101 : vector<2x128xf32>
    %108 = vector.extract_strided_slice %106 {offsets = [0, 0], sizes = [2, 32], strides = [1, 1]} : vector<2x128xf32> to vector<2x32xf32>
    %109 = vector.extract_strided_slice %106 {offsets = [0, 32], sizes = [2, 32], strides = [1, 1]} : vector<2x128xf32> to vector<2x32xf32>
    %110 = vector.extract_strided_slice %107 {offsets = [0, 64], sizes = [2, 32], strides = [1, 1]} : vector<2x128xf32> to vector<2x32xf32>
    %111 = vector.extract_strided_slice %106 {offsets = [0, 96], sizes = [2, 32], strides = [1, 1]} : vector<2x128xf32> to vector<2x32xf32>
    %112 = arith.mulf %109, %96 : vector<2x32xf32>
    %113 = arith.mulf %108, %110 : vector<2x32xf32>
    %114 = arith.addf %112, %113 : vector<2x32xf32>
    %115 = math.tanh %114 : vector<2x32xf32>
    %116 = arith.mulf %111, %115 : vector<2x32xf32>
    %117 = math.tanh %80 : vector<2x32xf32>
    %118 = math.tanh %98 : vector<2x32xf32>
    %119 = math.tanh %96 : vector<2x32xf32>
    %120 = tpu.concatenate %26, %44, %62, %80, %98, %116, %117, %118 in 1 : vector<2x32xf32>, vector<2x32xf32>, vector<2x32xf32>, vector<2x32xf32>, vector<2x32xf32>, vector<2x32xf32>, vector<2x32xf32>, vector<2x32xf32> -> vector<2x256xf32>
    %c0_23 = arith.constant 0 : index
    %c0_24 = arith.constant 0 : index
    %121 = vector.load %arg6[%c0_23, %c0_24] : memref<2x256xf32, #tpu.memory_space<vmem>>, vector<2x256xf32>
    tpu.vector_store %arg6[%c0_23, %c0_24], %120 {strides = array<i32>} : memref<2x256xf32, #tpu.memory_space<vmem>>, vector<2x256xf32>,
    %c0_25 = arith.constant 0 : index
    %c0_26 = arith.constant 0 : index
    %122 = vector.load %arg7[%c0_25, %c0_26] : memref<2x32xf32, #tpu.memory_space<vmem>>, vector<2x32xf32>
    tpu.vector_store %arg7[%c0_25, %c0_26], %118 {strides = array<i32>} : memref<2x32xf32, #tpu.memory_space<vmem>>, vector<2x32xf32>,
    %c0_27 = arith.constant 0 : index
    %c0_28 = arith.constant 0 : index
    %123 = vector.load %arg8[%c0_27, %c0_28] : memref<2x32xf32, #tpu.memory_space<vmem>>, vector<2x32xf32>
    tpu.vector_store %arg8[%c0_27, %c0_28], %119 {strides = array<i32>} : memref<2x32xf32, #tpu.memory_space<vmem>>, vector<2x32xf32>,
    return
  }
}

</mosaic_0001>

<bundles_post_ra>
// kernel: tpu_custom_call.1
= control target key start
LH: loop header
LB: loop body
LE: loop exit
PB: predicated region body
PF: predicated region fallthrough
CT: control target
= control target key end

     0   :  { %14 = vsyncpa [#allocation3], 0  ;;  %s1432_s0 = inlined_call_operand.vmem [shape: f32[16,8], index: 0, kind: input, shape index: {}]   ;;  %s1433_s1 = inlined_call_operand.vmem [shape: f32[2,32], index: 1, kind: input, shape index: {}]   ;;  %s1434_s2 = inlined_call_operand.vmem [shape: f32[2,32], index: 2, kind: input, shape index: {}]   ;;  %s1435_s3 = inlined_call_operand.hbm [shape: f32[8,128], index: 3, kind: input, shape index: {}]   ;;  %s1436_s4 = inlined_call_operand.vmem [shape: f32[32,128], index: 4, kind: input, shape index: {}]   ;;  %s1437_s5 = inlined_call_operand.vmem [shape: f32[1,128], index: 5, kind: input, shape index: {}]   ;;  %s1438_s6 = inlined_call_operand.hbm [shape: f32[2,256], index: 6, kind: output, shape index: {0}]   ;;  %s1439_s7 = inlined_call_operand.hbm [shape: f32[2,32], index: 7, kind: output, shape index: {1}]   ;;  %s1440_s8 = inlined_call_operand.hbm [shape: f32[2,32], index: 8, kind: output, shape index: {2}]  }
   0x1   :  { %15 = vsyncpa [#allocation4], 0 }
   0x2   :  { %16 = vsyncpa [#allocation7], 0  ;;  %s1176_s27 = smov [#allocation2]   ;;  %s1082_s9 = scalar_lea.hbm %s1435_s3, 128 }
   0x3   :  { %s29_s28 = sshll.u32 %s1176_s27, 4  ;;  %p1083_p0 = scmp.ne.s32.totalorder %s1435_s3, %s1082_s9  ;;  %s30_s28 = int_to_ptr.vmem [resolvable:$true] %s29_s28 }
   0x4   :  { %p1086_p1 = scmp.lt.u32.totalorder %s1082_s9, %s1435_s3 }
   0x6   :  { %p1088_p2 = pnand %p1086_p1, %p1083_p0 }
   0x8   :  { %1091 = shalt.err (!%p1088_p2)
}
   0x9   :  { %s1092_s14 = scalar_lea.vmem %s30_s28, 128  ;;  %p1097_p4 = scmp.lt.s32.totalorder %s30_s28, %s30_s28 }
   0xa   :  { %p1093_p3 = scmp.ne.s32.totalorder %s30_s28, %s1092_s14  ;;  %p1098_p5 = scmp.lt.s32.totalorder %s1092_s14, %s1092_s14 }
   0xc   :  { %p1099_p6 = por %p1098_p5, %p1097_p4 }
   0xe   :  { %p1100_p7 = pnand %p1099_p6, %p1093_p3 }
  0x10   :  { %1103 = shalt.err (!%p1100_p7)
}
  0x11   :  { %32 = dma.hbm_to_vmem [thread:$0]  %s1435_s3, 128, %s30_s28, [#allocation3]  }
  0x12   :  { %1170 = dma.done.wait [#allocation3], 128  }
  0x13   :  { %1171 = vsyncadd [#allocation3], 4294967168  ;;  %v1177_v0 = vmov 0.0|0.0   ;;  %vm1178_vm0 = vmmov 0   ;;  %v1179_v1 = vmov 0.0   ;;  %vm50_vm1 = vcmask 64512  }
  0x14   :  { %984 = vmatprep.subr.bf16.mxu1 %v1177_v0  ;;  %926 = vmatprep.mubr.msk.f32.mxu1 %vm1178_vm0, %v1179_v1  ;;  %v132_v2 = vld [vmem:[%s1436_s4] sm:$0xff]  ;;  %v133_v3 = vld [vmem:[%s1436_s4 + $0x8] sm:$0xff]  ;;  %v134_v8 = vld [vmem:[%s1436_s4 + $0x10] sm:$0xff]  ;;  %vm138_vm2 = vcmask 261120   ;;  %s1180_s29 = smov 64   ;;  %vm793_vm3 = vcmask 523264  }
  0x15   :  { %v42_v4 = vld [vmem:[#allocation2] sm:$0xff]  ;;  %v1252_v5 = vpack.c.bf16 %v133_v3, %v132_v2  ;;  %v41_v7 = vld [vmem:[%s1432_s0 + $0x8] sm:$0xff]  ;;  %v135_v9 = vld [vmem:[%s1436_s4 + $0x18] sm:$0xff]  ;;  %vm816_vm4 = vcmask 254976   ;;  %s1183_s10 = smov [#allocation6]  }
  0x16   :  { %913 = vmatprep.subr.mxu0 %v42_v4  ;;  %v40_v6 = vld [vmem:[%s1432_s0] sm:$0xff]  ;;  %v1267_v10 = vpack.c.bf16 %v135_v9, %v134_v8  ;;  %s838_s11 = sshll.u32 %s1183_s10, 4  ;;  %s839_s11 = int_to_ptr.vmem [resolvable:$true] %s838_s11 }
  0x17   :  { %914 = vmatpush3.msra.mxu0 %v42_v4  ;;  %915 = vmatprep.mubr.msk.f32.mxu0 %vm50_vm1, %v40_v6  ;;  %v136_v11 = vld [vmem:[%s1433_s1] sm:$0x3]  ;;  %s1104_s12 = scalar_lea.vmem %s839_s11, 32  ;;  %p1109_p9 = scmp.lt.s32.totalorder %s839_s11, %s839_s11 }
  0x18   :  { %986 = vmatpush3.bf16.msra.mxu1 %v1252_v5  ;;  %916 = vmatmul.mubr.msk.f32.vlgmr.msra.gmra.mrb[0].mxu0 %vm50_vm1, %v41_v7  ;;  %v864_v12 = vld [vmem:[%s1437_s5] ss:$0 sm:$0xff]  ;;  %s1181_s5 = smov 32   ;;  %p1105_p8 = scmp.ne.s32.totalorder %s839_s11, %s1104_s12 }
  0x19   :  { %987 = vmatprep.subr.bf16.mxu1 %v1177_v0  ;;  %990 = vmatprep.subr.bf16.mxu0 %v1177_v0  ;;  %v137_v21 = vld [vmem:[%s1434_s2] sm:$0x3]  ;;  %s1182_s2 = smov 96   ;;  %p1110_p10 = scmp.lt.s32.totalorder %s1104_s12, %s1104_s12 }
  0x1a   :  { %992 = vmatpush3.bf16.msra.mxu0 %v1252_v5  ;;  %937 = vmatprep.mubr.msk.f32.mxu0 %vm1178_vm0, %v1179_v1 }
  0x1b   :  { %993 = vmatprep.subr.bf16.mxu0 %v1177_v0  ;;  %p1111_p11 = por %p1110_p10, %p1109_p9 }
  0x1c   :  { %989 = vmatpush3.bf16.msra.mxu1 %v1267_v10 }
  0x1d   :  { %996 = vmatprep.subr.bf16.mxu1 %v1177_v0  ;;  %p1112_p12 = pnand %p1111_p11, %p1105_p8 }
  0x1e   :  { %995 = vmatpush3.bf16.msra.mxu0 %v1267_v10 }
  0x1f   :  { %927 = vmatmul.mubr.msk.f32.vlgmr.msra.gmra.mrb[0].mxu1 %vm138_vm2, %v136_v11  ;;  %1002 = vmatprep.subr.bf16.mxu0 %v1177_v0 }
  0x20   :  { %998 = vmatpush3.bf16.msra.mxu1 %v1252_v5  ;;  %948 = vmatprep.mubr.msk.f32.mxu1 %vm1178_vm0, %v1179_v1 }
  0x21   :  { %999 = vmatprep.subr.bf16.mxu1 %v1177_v0 }
  0x24   :  { %1001 = vmatpush3.bf16.msra.mxu1 %v1267_v10 }
  0x25   :  { %1008 = vmatprep.subr.bf16.mxu1 %v1177_v0 }
  0xeb   :  { %v917_v13 = vpop.f32.mrb[0].mxu0 }
  0xec   :  { %v1292_v14 = vadd.f32 %v917_v13, %v864_v12  ;;  %v123_v15 = vpop.f32.mrb[1].mxu0 }
  0xed   :  { %v1294_v16 = vadd.f32 %v864_v12, %v123_v15 }
  0xf2   :  { %v208_v17 = vpop.f32.mrb[0].mxu1 }
  0xf3   :  { %v212_v18 = vadd.f32 %v208_v17, %v1294_v16  ;;  %v928_v19 = vpop.f32.mrb[1].mxu1 }
  0xf5   :  { %1030 = vtanh.f32 %v212_v18  ;;  %v868_v22 = vmul.f32 -1.442695, %v212_v18 }
  0xf7   :  { %1032 = vpow2.f32 %v868_v22 }
  0xff   :  { %v1031_v20 = vpop.eup %1030 }
 0x100   :  { %226 = vrot.lane.b32.xlu0 %v1031_v20, %s1180_s29 }
 0x101   :  { %v1033_v23 = vpop.eup %1032 }
 0x102   :  { %v216_v24 = vadd.f32 1.0, %v1033_v23 }
 0x104   :  { %221 = vrot.lane.b32.xlu0 %v137_v21, %s1181_s5  ;;  %1034 = vrcp.f32 %v216_v24 }
 0x10e   :  { %v1035_v25 = vpop.eup %1034 }
 0x172   :  { %v227_v26 = vpop.permute.xlu0 %226 }
 0x173   :  { %v229_v27 = vmul.f32 %v1035_v25, %v227_v26 }
 0x175   :  { %231 = vrot.lane.b32.xlu1 %v229_v27, %s1181_s5 }
 0x176   :  { %v222_v28 = vpop.permute.xlu0 %221 }
 0x177   :  { %v224_v29 = vmul.f32 %v1035_v25, %v222_v28 }
 0x1e7   :  { %v232_v30 = vpop.permute.xlu1 %231 }
 0x1e8   :  { %v234_v31 = vadd.f32 %v232_v30, %v224_v29 }
 0x1ea   :  { %1036 = vtanh.f32 %v234_v31  ;;  %v328_v47 = vrot.slane %v234_v31, 6 }
 0x1f4   :  { %v1037_v32 = vpop.eup %1036 }
 0x1f5   :  { %237 = vrot.lane.b32.xlu1 %v1037_v32, %s1180_s29 }
 0x267   :  { %v238_v33 = vpop.permute.xlu1 %237 }
 0x268   :  { %v240_v34 = vmul.f32 %v1035_v25, %v238_v33 }
 0x26a   :  { %242 = vrot.lane.b32.xlu0 %v240_v34, %s1181_s5 }
 0x2dc   :  { %v1305_v35 = vpop.permute.xlu0 %242 }
 0x2dd   :  { %938 = vmatmul.mubr.msk.f32.vlgmr.msra.gmra.mrb[2].mxu0 %vm138_vm2, %v1305_v35 }
 0x2de   :  { %1004 = vmatpush3.bf16.msra.mxu0 %v1252_v5  ;;  %959 = vmatprep.mubr.msk.f32.mxu0 %vm1178_vm0, %v1179_v1 }
 0x2df   :  { %1005 = vmatprep.subr.bf16.mxu0 %v1177_v0 }
 0x2e2   :  { %1007 = vmatpush3.bf16.msra.mxu0 %v1267_v10 }
 0x2e3   :  { %1014 = vmatprep.subr.bf16.mxu0 %v1177_v0 }
 0x3b0   :  { %v312_v36 = vpop.f32.mrb[2].mxu0 }
 0x3b1   :  { %v317_v37 = vrot.slane %v312_v36, 6  ;;  %v939_v38 = vpop.f32.mrb[3].mxu0 }
 0x3b3   :  { %v319_v39 = vadd.f32 %v317_v37, %v1294_v16 }
 0x3b5   :  { %1038 = vtanh.f32 %v319_v39  ;;  %v870_v41 = vmul.f32 -1.442695, %v319_v39 }
 0x3b7   :  { %1040 = vpow2.f32 %v870_v41 }
 0x3bf   :  { %v1039_v40 = vpop.eup %1038 }
 0x3c0   :  { %332 = vrot.lane.b32.xlu1 %v1039_v40, %s1180_s29 }
 0x3c1   :  { %v1041_v42 = vpop.eup %1040 }
 0x3c2   :  { %v323_v43 = vadd.f32 1.0, %v1041_v42 }
 0x3c4   :  { %1042 = vrcp.f32 %v323_v43 }
 0x3ce   :  { %v1043_v44 = vpop.eup %1042 }
 0x3cf   :  { %v330_v48 = vmul.f32 %v1043_v44, %v328_v47 }
 0x432   :  { %v333_v45 = vpop.permute.xlu1 %332 }
 0x433   :  { %v335_v46 = vmul.f32 %v1043_v44, %v333_v45 }
 0x435   :  { %337 = vrot.lane.b32.xlu0 %v335_v46, %s1181_s5 }
 0x4a7   :  { %v338_v49 = vpop.permute.xlu0 %337 }
 0x4a8   :  { %v340_v50 = vadd.f32 %v338_v49, %v330_v48 }
 0x4aa   :  { %1044 = vtanh.f32 %v340_v50  ;;  %v435_v6 = vrot.slane %v340_v50, 6 }
 0x4b4   :  { %v1045_v51 = vpop.eup %1044 }
 0x4b5   :  { %343 = vrot.lane.b32.xlu1 %v1045_v51, %s1180_s29 }
 0x527   :  { %v344_v52 = vpop.permute.xlu1 %343 }
 0x528   :  { %v1319_v53 = vmul.f32 %v1043_v44, %v344_v52 }
 0x52a   :  { %v348_v54 = vrot.slane %v1319_v53, 2 }
 0x52c   :  { %349 = vrot.lane.b32.xlu0 %v348_v54, %s1181_s5 }
 0x59e   :  { %v350_v55 = vpop.permute.xlu0 %349 }
 0x59f   :  { %949 = vmatmul.mubr.msk.f32.vlgmr.msra.gmra.mrb[2].mxu1 %vm138_vm2, %v350_v55 }
 0x5a0   :  { %1010 = vmatpush3.bf16.msra.mxu1 %v1252_v5  ;;  %970 = vmatprep.mubr.msk.f32.mxu1 %vm1178_vm0, %v1179_v1 }
 0x5a1   :  { %1011 = vmatprep.subr.bf16.mxu1 %v1177_v0 }
 0x5a4   :  { %1013 = vmatpush3.bf16.msra.mxu1 %v1267_v10 }
 0x672   :  { %v419_v56 = vpop.f32.mrb[2].mxu1 }
 0x673   :  { %v424_v57 = vrot.slane %v419_v56, 4  ;;  %v950_v58 = vpop.f32.mrb[3].mxu1 }
 0x675   :  { %v426_v59 = vadd.f32 %v424_v57, %v1294_v16 }
 0x677   :  { %1046 = vtanh.f32 %v426_v59  ;;  %v872_v61 = vmul.f32 -1.442695, %v426_v59 }
 0x679   :  { %1048 = vpow2.f32 %v872_v61 }
 0x681   :  { %v1047_v60 = vpop.eup %1046 }
 0x682   :  { %439 = vrot.lane.b32.xlu1 %v1047_v60, %s1180_s29 }
 0x683   :  { %v1049_v62 = vpop.eup %1048 }
 0x684   :  { %v430_v63 = vadd.f32 1.0, %v1049_v62 }
 0x686   :  { %1050 = vrcp.f32 %v430_v63 }
 0x690   :  { %v1051_v2 = vpop.eup %1050 }
 0x691   :  { %v437_v7 = vmul.f32 %v1051_v2, %v435_v6 }
 0x6f4   :  { %v440_v3 = vpop.permute.xlu1 %439 }
 0x6f5   :  { %v442_v4 = vmul.f32 %v1051_v2, %v440_v3 }
 0x6f7   :  { %444 = vrot.lane.b32.xlu0 %v442_v4, %s1181_s5 }
 0x769   :  { %v445_v8 = vpop.permute.xlu0 %444 }
 0x76a   :  { %v447_v9 = vadd.f32 %v445_v8, %v437_v7 }
 0x76c   :  { %1052 = vtanh.f32 %v447_v9 }
 0x776   :  { %v1053_v11 = vpop.eup %1052 }
 0x777   :  { %450 = vrot.lane.b32.xlu1 %v1053_v11, %s1180_s29 }
 0x7e9   :  { %v451_v12 = vpop.permute.xlu1 %450 }
 0x7ea   :  { %v1335_v13 = vmul.f32 %v1051_v2, %v451_v12 }
 0x7ec   :  { %v455_v15 = vrot.slane %v1335_v13, 4 }
 0x7ee   :  { %456 = vrot.lane.b32.xlu0 %v455_v15, %s1181_s5 }
 0x860   :  { %v457_v17 = vpop.permute.xlu0 %456 }
 0x861   :  { %960 = vmatmul.mubr.msk.f32.vlgmr.msra.gmra.mrb[4].mxu0 %vm138_vm2, %v457_v17 }
 0x862   :  { %1016 = vmatpush3.bf16.msra.mxu0 %v1252_v5  ;;  %981 = vmatprep.mubr.msk.f32.mxu0 %vm1178_vm0, %v1179_v1 }
 0x863   :  { %1017 = vmatprep.subr.bf16.mxu0 %v1177_v0  ;;  %v542_v0 = vrot.slane %v447_v9, 6 }
 0x866   :  { %1019 = vmatpush3.bf16.msra.mxu0 %v1267_v10 }
 0x934   :  { %v526_v18 = vpop.f32.mrb[4].mxu0 }
 0x935   :  { %v531_v19 = vrot.slane %v526_v18, 2  ;;  %v961_v20 = vpop.f32.mrb[5].mxu0 }
 0x937   :  { %v533_v21 = vadd.f32 %v531_v19, %v1294_v16 }
 0x939   :  { %1054 = vtanh.f32 %v533_v21  ;;  %v874_v23 = vmul.f32 -1.442695, %v533_v21 }
 0x93b   :  { %1056 = vpow2.f32 %v874_v23 }
 0x943   :  { %v1055_v22 = vpop.eup %1054 }
 0x944   :  { %546 = vrot.lane.b32.xlu1 %v1055_v22, %s1180_s29 }
 0x945   :  { %v1057_v24 = vpop.eup %1056 }
 0x946   :  { %v537_v5 = vadd.f32 1.0, %v1057_v24 }
 0x948   :  { %1058 = vrcp.f32 %v537_v5 }
 0x952   :  { %v1059_v25 = vpop.eup %1058 }
 0x953   :  { %v544_v10 = vmul.f32 %v1059_v25, %v542_v0 }
 0x9b6   :  { %v547_v1 = vpop.permute.xlu1 %546 }
 0x9b7   :  { %v549_v26 = vmul.f32 %v1059_v25, %v547_v1 }
 0x9b9   :  { %551 = vrot.lane.b32.xlu0 %v549_v26, %s1181_s5 }
 0xa2b   :  { %v552_v27 = vpop.permute.xlu0 %551 }
 0xa2c   :  { %v554_v28 = vadd.f32 %v552_v27, %v544_v10 }
 0xa2e   :  { %1060 = vtanh.f32 %v554_v28  ;;  %v646_v44 = vrot.slane %v554_v28, 6 }
 0xa38   :  { %v1061_v16 = vpop.eup %1060 }
 0xa39   :  { %557 = vrot.lane.b32.xlu1 %v1061_v16, %s1180_s29 }
 0xaab   :  { %v558_v29 = vpop.permute.xlu1 %557 }
 0xaac   :  { %v1351_v30 = vmul.f32 %v1059_v25, %v558_v29 }
 0xaae   :  { %v562_v31 = vrot.slane %v1351_v30, 6 }
 0xab0   :  { %563 = vrot.lane.b32.xlu0 %v562_v31, %s1181_s5 }
 0xb22   :  { %v564_v32 = vpop.permute.xlu0 %563 }
 0xb23   :  { %971 = vmatmul.mubr.msk.f32.vlgmr.msra.gmra.mrb[4].mxu1 %vm138_vm2, %v564_v32 }
 0xbf6   :  { %v633_v33 = vpop.f32.mrb[4].mxu1 }
 0xbf7   :  { %v637_v34 = vadd.f32 %v633_v33, %v1292_v14  ;;  %v972_v36 = vpop.f32.mrb[5].mxu1 }
 0xbf9   :  { %1062 = vtanh.f32 %v637_v34  ;;  %v876_v38 = vmul.f32 -1.442695, %v637_v34 }
 0xbfb   :  { %1064 = vpow2.f32 %v876_v38 }
 0xc03   :  { %v1063_v37 = vpop.eup %1062 }
 0xc04   :  { %650 = vrot.lane.b32.xlu1 %v1063_v37, %s1180_s29 }
 0xc05   :  { %v1065_v39 = vpop.eup %1064 }
 0xc06   :  { %v641_v40 = vadd.f32 1.0, %v1065_v39 }
 0xc08   :  { %1066 = vrcp.f32 %v641_v40 }
 0xc12   :  { %v1067_v41 = vpop.eup %1066 }
 0xc13   :  { %v648_v45 = vmul.f32 %v1067_v41, %v646_v44 }
 0xc76   :  { %v651_v42 = vpop.permute.xlu1 %650 }
 0xc77   :  { %v653_v43 = vmul.f32 %v1067_v41, %v651_v42 }
 0xc79   :  { %655 = vrot.lane.b32.xlu0 %v653_v43, %s1181_s5 }
 0xceb   :  { %v656_v46 = vpop.permute.xlu0 %655 }
 0xcec   :  { %v658_v47 = vadd.f32 %v656_v46, %v648_v45 }
 0xcee   :  { %1068 = vtanh.f32 %v658_v47  ;;  %v752_v3 = vrot.slane %v658_v47, 6 }
 0xcf8   :  { %v1361_v48 = vpop.eup %1068 }
 0xcf9   :  { %661 = vrot.lane.b32.xlu1 %v1361_v48, %s1180_s29 }
 0xd6b   :  { %v662_v49 = vpop.permute.xlu1 %661 }
 0xd6c   :  { %v664_v50 = vmul.f32 %v1067_v41, %v662_v49 }
 0xd6e   :  { %666 = vrot.lane.b32.xlu0 %v664_v50, %s1181_s5 }
 0xde0   :  { %v1366_v51 = vpop.permute.xlu0 %666 }
 0xde1   :  { %982 = vmatmul.mubr.msk.f32.vlgmr.msra.gmra.mrb[6].mxu0 %vm138_vm2, %v1366_v51 }
 0xeb4   :  { %v736_v52 = vpop.f32.mrb[6].mxu0 }
 0xeb5   :  { %v741_v55 = vrot.slane %v736_v52, 6  ;;  %v983_v56 = vpop.f32.mrb[7].mxu0 }
 0xeb7   :  { %v743_v57 = vadd.f32 %v741_v55, %v1292_v14 }
 0xeb9   :  { %1070 = vtanh.f32 %v743_v57  ;;  %v878_v59 = vmul.f32 -1.442695, %v743_v57 }
 0xebb   :  { %1072 = vpow2.f32 %v878_v59 }
 0xec3   :  { %v1071_v58 = vpop.eup %1070 }
 0xec4   :  { %756 = vrot.lane.b32.xlu1 %v1071_v58, %s1180_s29 }
 0xec5   :  { %v1073_v60 = vpop.eup %1072 }
 0xec6   :  { %v747_v61 = vadd.f32 1.0, %v1073_v60 }
 0xec8   :  { %1074 = vrcp.f32 %v747_v61 }
 0xec9   :  { %1076 = vtanh.f32 %v664_v50 }
 0xed2   :  { %v1075_v62 = vpop.eup %1074 }
 0xed3   :  { %v1077_v14 = vpop.eup %1076  ;;  %v754_v4 = vmul.f32 %v1075_v62, %v752_v3 }
 0xf36   :  { %v757_v63 = vpop.permute.xlu1 %756 }
 0xf37   :  { %v759_v2 = vmul.f32 %v1075_v62, %v757_v63 }
 0xf39   :  { %761 = vrot.lane.b32.xlu0 %v759_v2, %s1181_s5 }
 0xf3d   :  { %774 = vrot.lane.b32.xlu0 %v348_v54, %s1180_s29 }
 0xf41   :  { %777 = vrot.lane.b32.xlu0 %v455_v15, %s1182_s2 }
 0xf45   :  { %813 = vrot.lane.b32.xlu0 %v1077_v14, %s1181_s5 }
 0xfab   :  { %v762_v6 = vpop.permute.xlu0 %761 }
 0xfac   :  { %v764_v7 = vadd.f32 %v762_v6, %v754_v4 }
 0xfae   :  { %1078 = vtanh.f32 %v764_v7 }
 0xfaf   :  { %v775_v8 = vpop.permute.xlu0 %774  ;;  %1080 = vtanh.f32 %v1351_v30 }
 0xfb0   :  { %v792_v9 = vsel %vm138_vm2, %v1305_v35, %v775_v8 }
 0xfb3   :  { %v778_v53 = vpop.permute.xlu0 %777 }
 0xfb4   :  { %v794_v54 = vsel %vm793_vm3, %v792_v9, %v778_v53 }
 0xfb7   :  { %v814_v11 = vpop.permute.xlu0 %813 }
 0xfb8   :  { %v1079_v12 = vpop.eup %1078  ;;  %817 = vst.msk [vmem:[#allocation6] sm:$0x3] %vm816_vm4, %v814_v11 }
 0xfb9   :  { %767 = vrot.lane.b32.xlu1 %v1079_v12, %s1180_s29 }
0x102b   :  { %v768_v13 = vpop.permute.xlu1 %767 }
0x102c   :  { %1115 = shalt.err (!%p1112_p12)
}
0x102d   :  { %s1116_s15 = scalar_lea.hbm %s1439_s7, 32 }
0x102e   :  { %p1117_p13 = scmp.ne.s32.totalorder %s1439_s7, %s1116_s15  ;;  %p1120_p0 = scmp.lt.u32.totalorder %s1116_s15, %s1439_s7 }
0x1030   :  { %p1122_p1 = pnand %p1120_p0, %p1117_p13 }
0x1032   :  { %1125 = shalt.err (!%p1122_p1)
}
0x1033   :  { %841 = dma.vmem_to_hbm [thread:$0]  %s839_s11, 32, %s1439_s7, [#allocation7]   ;;  %v770_v35 = vmul.f32 %v1075_v62, %v768_v13  ;;  %v1081_v17 = vpop.eup %1080  ;;  %vm795_vm5 = vcmask 785408  }
0x1034   :  { %v788_v18 = vrot.slane %v1081_v17, 6  ;;  %s1184_s21 = smov [#allocation5]   ;;  %s1185_s7 = smov [#allocation8]   ;;  %v796_v23 = vsel %vm795_vm5, %v794_v54, %v562_v31 }
0x1035   :  { %v783_v15 = vrot.slane %v770_v35, 2  ;;  %s828_s22 = sshll.u32 %s1184_s21, 4  ;;  %s848_s23 = sshll.u32 %s1185_s7, 4  ;;  %s829_s22 = int_to_ptr.vmem [resolvable:$true] %s828_s22  ;;  %s849_s23 = int_to_ptr.vmem [resolvable:$true] %s848_s23 }
0x1036   :  { %s1126_s24 = scalar_lea.vmem %s829_s22, 64  ;;  %p1131_p3 = scmp.lt.s32.totalorder %s829_s22, %s829_s22 }
0x1037   :  { %784 = vrot.lane.b32.xlu1 %v783_v15, %s1180_s29  ;;  %p1127_p2 = scmp.ne.s32.totalorder %s829_s22, %s1126_s24  ;;  %p1132_p4 = scmp.lt.s32.totalorder %s1126_s24, %s1126_s24 }
0x1039   :  { %p1133_p5 = por %p1132_p4, %p1131_p3 }
0x103b   :  { %789 = vrot.lane.b32.xlu1 %v788_v18, %s1182_s2  ;;  %p1134_p6 = pnand %p1133_p5, %p1127_p2 }
0x103f   :  { %818 = vrot.lane.b32.xlu1 %v1361_v48, %s1182_s2 }
0x10a9   :  { %v785_v19 = vpop.permute.xlu1 %784 }
0x10aa   :  { %v797_v20 = vsel %vm138_vm2, %v1366_v51, %v785_v19 }
0x10ad   :  { %v790_v21 = vpop.permute.xlu1 %789 }
0x10ae   :  { %v798_v22 = vsel %vm793_vm3, %v797_v20, %v790_v21 }
0x10af   :  { %v799_v24 = vsel %vm795_vm5, %v798_v22, %v1077_v14 }
0x10b0   :  { %v802_v5 = vcombine.low %v796_v23, %v799_v24 }
0x10b1   :  { %v819_v25 = vpop.permute.xlu1 %818 }
0x10b2   :  { %821 = vst.msk [vmem:[#allocation8] sm:$0x3] %vm816_vm4, %v819_v25  ;;  %879 = vst.sshfl [vmem:[#allocation5] sm:$0x33 pattern:$0x76325410] %v802_v5 }
0x10b3   :  { %1137 = shalt.err (!%p1134_p6)
}
0x10b4   :  { %s1138_s27 = scalar_lea.hbm %s1438_s6, 64 }
0x10b5   :  { %p1139_p7 = scmp.ne.s32.totalorder %s1438_s6, %s1138_s27  ;;  %p1142_p8 = scmp.lt.u32.totalorder %s1138_s27, %s1438_s6 }
0x10b7   :  { %p1144_p9 = pnand %p1142_p8, %p1139_p7 }
0x10b9   :  { %1147 = shalt.err (!%p1144_p9)
}
0x10ba   :  { %831 = dma.vmem_to_hbm [thread:$0]  %s829_s22, 64, %s1438_s6, [#allocation4]  }
0x10bb   :  { %s1148_s9 = scalar_lea.vmem %s849_s23, 32  ;;  %p1153_p11 = scmp.lt.s32.totalorder %s849_s23, %s849_s23 }
0x10bc   :  { %p1149_p10 = scmp.ne.s32.totalorder %s849_s23, %s1148_s9  ;;  %p1154_p12 = scmp.lt.s32.totalorder %s1148_s9, %s1148_s9 }
0x10be   :  { %p1155_p13 = por %p1154_p12, %p1153_p11 }
0x10c0   :  { %p1156_p0 = pnand %p1155_p13, %p1149_p10 }
0x10c2   :  { %1159 = shalt.err (!%p1156_p0)
}
0x10c3   :  { %s1160_s10 = scalar_lea.hbm %s1440_s8, 32 }
0x10c4   :  { %p1161_p1 = scmp.ne.s32.totalorder %s1440_s8, %s1160_s10  ;;  %p1164_p2 = scmp.lt.u32.totalorder %s1160_s10, %s1440_s8 }
0x10c6   :  { %p1166_p3 = pnand %p1164_p2, %p1161_p1 }
0x10c8   :  { %1169 = shalt.err (!%p1166_p3)
}
0x10c9   :  { %851 = dma.vmem_to_hbm [thread:$0]  %s849_s23, 32, %s1440_s8, [#allocation7]  }
0x10ca   :  { %1172 = dma.done.wait [#allocation4], 64  }
0x10cb   :  { %1173 = vsyncadd [#allocation4], 4294967232 }
0x10cc   :  { %1174 = dma.done.wait [#allocation7], 64  }
0x10cd   :  { %1175 = vsyncadd [#allocation7], 4294967232 }
0x10ce   :  { %861 = vsyncpa [#allocation3], 1 }
0x10cf   :  { %862 = vsyncpa [#allocation4], 1 }
0x10d0   :  { %863 = vsyncpa [#allocation7], 1 }

</bundles_post_ra>
